<compile_context>
chip_gen: v7x
topology: tpu7x:2x2x1
jax: 0.10.0
libtpu: 0.0.40
codegen_flags: <defaults>
</compile_context>

<pallas_src>
import functools

import jax
import jax.numpy as jnp
from jax.experimental import pallas as pl
from jax.experimental.pallas import tpu as pltpu

NEG_SLOPE = 0.2        # PyG GATConv default negative_slope
LANES = 128
TILE_I = 256           # target-node columns per attention block (MXU-width aligned)
TILE_J = 256           # source-node rows per attention block
TILE_N = 256           # node rows per projection block
ALPHA_PAD = 128        # lane-padded width of the packed alpha output
MASK_VAL = -1e30       # finite "minus infinity": keeps exp(m_prev - m_new) NaN-free
VMEM_LIMIT = 32 * 1024 * 1024   # explicit budget; safe on v5e/v6e/v7x (64 MiB phys)


def _round_up(v, m):
    return (v + m - 1) // m * m


# --------------------------------------------------------------------------
# Kernel 1: linear projection + packed attention logits (+ transposed messages)
# --------------------------------------------------------------------------
def gat_project_kernel(x_ref, w_ref, a_ref, ht_ref, alpha_ref):
    """h = x @ W ; alpha = h @ A_packed ; emit h^T for the transposed aggregation."""
    h = jnp.dot(x_ref[...], w_ref[...], preferred_element_type=jnp.float32)
    # One MXU pass computes alpha_src and alpha_dst for every head.
    alpha_ref[...] = jnp.dot(h.astype(jnp.bfloat16), a_ref[...],
                             preferred_element_type=jnp.float32)
    # Transposed bf16 messages [H*C, tile_n]: downstream matmul is lane-dense.
    ht_ref[...] = jnp.transpose(h).astype(ht_ref.dtype)


def gat_project(x_bf, w_bf, a_bf, *, tile_n=TILE_N):
    n, fin = x_bf.shape
    hc = w_bf.shape[1]
    grid = (n // tile_n,)
    return pl.pallas_call(
        gat_project_kernel,
        grid_spec=pltpu.PrefetchScalarGridSpec(
            num_scalar_prefetch=0,
            grid=grid,
            in_specs=[
                pl.BlockSpec((tile_n, fin), lambda i: (i, 0)),        # x rows (bf16)
                pl.BlockSpec((fin, hc), lambda i: (0, 0)),            # W (resident)
                pl.BlockSpec((hc, ALPHA_PAD), lambda i: (0, 0)),      # A_packed
            ],
            out_specs=[
                pl.BlockSpec((hc, tile_n), lambda i: (0, i)),         # h^T (bf16)
                pl.BlockSpec((tile_n, ALPHA_PAD), lambda i: (i, 0)),  # alpha (f32)
            ],
        ),
        out_shape=(
            jax.ShapeDtypeStruct((hc, n), jnp.bfloat16),
            jax.ShapeDtypeStruct((n, ALPHA_PAD), jnp.float32),
        ),
        compiler_params=pltpu.CompilerParams(
            dimension_semantics=("parallel",),
            vmem_limit_bytes=VMEM_LIMIT),
    )(x_bf, w_bf, a_bf)


# --------------------------------------------------------------------------
# Kernel 2: flash-style masked softmax + transposed aggregation (+ fused epilogue)
# --------------------------------------------------------------------------
def gat_attn_kernel(counts_ref, a_src_ref, a_dstT_ref, ht_ref, adjT_ref,
                    bias_ref, out_ref, m_ref, l_ref, acc_ref,
                    *, heads, out_ch, concat, apply_elu):
    i = pl.program_id(0)
    j = pl.program_id(1)
    nj = pl.num_programs(1)

    @pl.when(j == 0)
    def _init():
        m_ref[...] = jnp.full(m_ref.shape, MASK_VAL, m_ref.dtype)
        l_ref[...] = jnp.zeros_like(l_ref)
        acc_ref[...] = jnp.zeros_like(acc_ref)

    # Block-sparse skip: tiles with zero edges contribute nothing (self loops keep
    # every diagonal tile populated, so state/finalize stay well-defined).
    # TODO(synk): use a data-dependent index_map to also skip the DMA of empty
    # adjacency tiles (currently only compute is skipped).
    @pl.when(counts_ref[i * nj + j] > 0)
    def _tile():
        # Boolean edge mask straight from the int8 stream; adjacency never hits
        # the MXU and never materializes as f32.
        mask = adjT_ref[...].astype(jnp.int32) > 0       # [TJ, TI]
        h_src = ht_ref[...]                              # [H*C, TJ] bf16 messages
        m_all = m_ref[...]                               # [H, TI]
        l_all = l_ref[...]                               # [H, TI]
        m_rows, l_rows = [], []
        for hh in range(heads):                          # heads is small & static
            sl = slice(hh * out_ch, (hh + 1) * out_ch)
            a_s = a_src_ref[:, hh:hh + 1]                # [TJ, 1]
            a_d = a_dstT_ref[hh:hh + 1, :]               # [1, TI]
            raw = a_s + a_d                              # [TJ, TI]
            e = jnp.where(mask,
                          jnp.where(raw >= 0.0, raw, NEG_SLOPE * raw),
                          MASK_VAL)
            m_prev = m_all[hh:hh + 1, :]                 # [1, TI]
            # axis-0 (sublane) reductions are the cheap direction on the XLU.
            m_new = jnp.maximum(m_prev, jnp.max(e, axis=0, keepdims=True))
            scale = jnp.exp(m_prev - m_new)              # [1, TI]
            p = jnp.where(mask, jnp.exp(e - m_new), 0.0)  # exact zeros off-graph
            l_rows.append(scale * l_all[hh:hh + 1, :]
                          + jnp.sum(p, axis=0, keepdims=True))
            m_rows.append(m_new)
            # Transposed aggregation: [C, TJ] x [TJ, TI] -> [C, TI]; the MXU N
            # dimension is the full 256-wide tile instead of 16 channels.
            acc_ref[sl, :] = scale * acc_ref[sl, :] + jnp.dot(
                h_src[sl, :], p.astype(h_src.dtype),
                preferred_element_type=jnp.float32)
        # One lane-dense store each for the running max / denominator.
        m_ref[...] = m_rows[0] if heads == 1 else jnp.concatenate(m_rows, axis=0)
        l_ref[...] = l_rows[0] if heads == 1 else jnp.concatenate(l_rows, axis=0)

    @pl.when(j == nj - 1)
    def _finalize():
        recip = pl.reciprocal(l_ref[...], approx=False)   # [H, TI], exact
        if concat:
            for hh in range(heads):
                sl = slice(hh * out_ch, (hh + 1) * out_ch)
                acc_ref[sl, :] = acc_ref[sl, :] * recip[hh:hh + 1, :]
            out_t = acc_ref[...]                          # [H*C, TI]
        else:                                             # head-mean (concat=False)
            out_t = acc_ref[0:out_ch, :] * recip[0:1, :]
            for hh in range(1, heads):
                sl = slice(hh * out_ch, (hh + 1) * out_ch)
                out_t = out_t + acc_ref[sl, :] * recip[hh:hh + 1, :]
            if heads > 1:
                out_t = out_t * (1.0 / heads)
        out = jnp.transpose(out_t) + bias_ref[...]        # [TI, out_width]
        if apply_elu:                                     # fused inter-layer ELU
            out = jnp.where(out > 0.0, out, jnp.exp(jnp.minimum(out, 0.0)) - 1.0)
        out_ref[...] = out.astype(out_ref.dtype)          # single lane-dense store


def gat_attention(counts, alpha_src, alpha_dstT, ht_bf, adj_t, bias2d, *,
                  heads, out_ch, concat, apply_elu, out_dtype,
                  tile_i=TILE_I, tile_j=TILE_J):
    hc, n = ht_bf.shape
    out_width = hc if concat else out_ch
    grid = (n // tile_i, n // tile_j)
    kernel = functools.partial(gat_attn_kernel, heads=heads, out_ch=out_ch,
                               concat=concat, apply_elu=apply_elu)
    return pl.pallas_call(
        kernel,
        grid_spec=pltpu.PrefetchScalarGridSpec(
            num_scalar_prefetch=1,                        # per-tile edge counts
            grid=grid,
            in_specs=[
                pl.BlockSpec((tile_j, heads), lambda i, j, c: (j, 0)),   # alpha_src
                pl.BlockSpec((heads, tile_i), lambda i, j, c: (0, i)),   # alpha_dst^T
                pl.BlockSpec((hc, tile_j), lambda i, j, c: (0, j)),      # h^T (bf16)
                pl.BlockSpec((tile_j, tile_i), lambda i, j, c: (j, i)),  # adj^T (int8)
                pl.BlockSpec((1, out_width), lambda i, j, c: (0, 0)),    # bias
            ],
            out_specs=pl.BlockSpec((tile_i, out_width), lambda i, j, c: (i, 0)),
            scratch_shapes=[
                pltpu.VMEM((heads, tile_i), jnp.float32),   # running max / head
                pltpu.VMEM((heads, tile_i), jnp.float32),   # running denominator
                pltpu.VMEM((hc, tile_i), jnp.float32),      # transposed accumulator
            ],
        ),
        out_shape=jax.ShapeDtypeStruct((n, out_width), out_dtype),
        # TODO(synk): on v7x verify the "parallel" i axis is actually sharded
        # across both TensorCores; fall back to CORE_PARALLEL / pl.core_map if not.
        compiler_params=pltpu.CompilerParams(
            dimension_semantics=("parallel", "arbitrary"),
            vmem_limit_bytes=VMEM_LIMIT),
    )(counts, alpha_src, alpha_dstT, ht_bf, adj_t, bias2d)


# --------------------------------------------------------------------------
# Layer / model wrappers
# --------------------------------------------------------------------------
def pack_attention(att_src, att_dst, heads, out_ch):
    """Block-diagonal [H*C, 128]: cols 0..H-1 -> alpha_src, H..2H-1 -> alpha_dst."""
    hc = heads * out_ch
    a = jnp.zeros((hc, ALPHA_PAD), jnp.float32)
    for h in range(heads):
        rows = slice(h * out_ch, (h + 1) * out_ch)
        a = a.at[rows, h].set(att_src[h])
        a = a.at[rows, heads + h].set(att_dst[h])
    return a


def tile_edge_counts(adj_t, tile_i=TILE_I, tile_j=TILE_J):
    """Per-(row-tile i, source-tile j) edge counts, flat int32 for SMEM prefetch."""
    n = adj_t.shape[0]
    nj, ni = n // tile_j, n // tile_i
    c = adj_t.astype(jnp.int32).reshape(nj, tile_j, ni, tile_i).sum(axis=(1, 3))
    return jnp.transpose(c).reshape(-1).astype(jnp.int32)   # row-major (i, j)


def gat_conv(x, adj_t, counts, w, att_src, att_dst, bias, *, heads, out_ch,
             concat, apply_elu, out_dtype):
    a_packed = pack_attention(att_src, att_dst, heads, out_ch).astype(jnp.bfloat16)
    ht_bf, alpha = gat_project(x.astype(jnp.bfloat16), w.astype(jnp.bfloat16),
                               a_packed)
    alpha_src = alpha[:, :heads]                             # [N, H]
    alpha_dstT = jnp.transpose(alpha[:, heads:2 * heads])    # [H, N]  (tiny glue op)
    out_width = (heads * out_ch) if concat else out_ch
    bias2d = bias.reshape(1, out_width).astype(jnp.float32)
    return gat_attention(counts, alpha_src, alpha_dstT, ht_bf, adj_t, bias2d,
                         heads=heads, out_ch=out_ch, concat=concat,
                         apply_elu=apply_elu, out_dtype=out_dtype)


def gat_forward(params, x, adj_t, edge_weight=None):
    # edge_weight accepted for API parity; GATConv(edge_dim=None) ignores it.
    del edge_weight
    n = x.shape[0]
    n_pad = adj_t.shape[0]
    if n_pad > n:
        x = jnp.pad(x, ((0, n_pad - n), (0, 0)))
    counts = tile_edge_counts(adj_t)

    heads, hidden, out_c = params["heads"], params["hidden"], params["out"]

    # Layer 1: `heads` heads, concat=True, fused ELU, bf16 output feeds layer 2.
    h = gat_conv(x, adj_t, counts, params["w1"], params["as1"], params["ad1"],
                 params["b1"], heads=heads, out_ch=hidden, concat=True,
                 apply_elu=True, out_dtype=jnp.bfloat16)

    # Layer 2: 1 head, concat=False. Pad the tiny out width to a lane-dense 128
    # so stores are unmasked; slice the real columns afterwards.
    c_pad = _round_up(out_c, LANES)
    pad = c_pad - out_c
    w2 = jnp.pad(params["w2"], ((0, 0), (0, pad)))
    as2 = jnp.pad(params["as2"], ((0, 0), (0, pad)))
    ad2 = jnp.pad(params["ad2"], ((0, 0), (0, pad)))
    b2 = jnp.pad(params["b2"], ((0, pad),))
    out = gat_conv(h, adj_t, counts, w2, as2, ad2, b2, heads=1, out_ch=c_pad,
                   concat=False, apply_elu=False, out_dtype=jnp.float32)
    return out[:n, :out_c]


def build_adjacency(edge_index, num_nodes, padded_nodes=None):
    """adjT[j, i] = 1 iff edge j->i; self loops on every (padded) node.

    Stored transposed and in int8: adjacency is only used in VPU compares/selects,
    never in the MXU, so the narrowest dtype minimizes the O(N^2) HBM stream.
    """
    if padded_nodes is None:
        padded_nodes = _round_up(num_nodes, max(TILE_I, TILE_J))
    src, dst = edge_index[0], edge_index[1]
    adj_t = jnp.zeros((padded_nodes, padded_nodes), jnp.int8)
    adj_t = adj_t.at[src, dst].set(1)
    diag = jnp.arange(padded_nodes)
    adj_t = adj_t.at[diag, diag].set(1)
    return adj_t


def init_params(key, in_ch, hidden, out_ch, heads):
    ks = jax.random.split(key, 8)
    scale = 0.1
    return {
        "heads": heads,
        "hidden": hidden,
        "out": out_ch,
        # layer 1: in_ch -> hidden, `heads` heads, concat=True
        "w1": scale * jax.random.normal(ks[0], (in_ch, heads * hidden), jnp.float32),
        "as1": scale * jax.random.normal(ks[1], (heads, hidden), jnp.float32),
        "ad1": scale * jax.random.normal(ks[2], (heads, hidden), jnp.float32),
        "b1": scale * jax.random.normal(ks[3], (heads * hidden,), jnp.float32),
        # layer 2: hidden*heads -> out_ch, 1 head, concat=False
        "w2": scale * jax.random.normal(ks[4], (hidden * heads, out_ch), jnp.float32),
        "as2": scale * jax.random.normal(ks[5], (1, out_ch), jnp.float32),
        "ad2": scale * jax.random.normal(ks[6], (1, out_ch), jnp.float32),
        "b2": scale * jax.random.normal(ks[7], (out_ch,), jnp.float32),
    }


if __name__ == "__main__":
    key = jax.random.PRNGKey(0)
    k_x, k_e1, k_e2, k_w, k_p = jax.random.split(key, 5)

    N = 16            # nodes
    IN_CH = 8
    HIDDEN = 16
    OUT_CH = 8
    HEADS = 8
    E = 48            # edges

    x = jax.random.normal(k_x, (N, IN_CH), jnp.float32)
    edge_index = jnp.stack([
        jax.random.randint(k_e1, (E,), 0, N),
        jax.random.randint(k_e2, (E,), 0, N),
    ], axis=0)
    edge_weight = jax.random.uniform(k_w, (E,), jnp.float32)  # ignored by GATConv

    adj_t = build_adjacency(edge_index, N)        # padded to 256, transposed, int8
    params = init_params(k_p, IN_CH, HIDDEN, OUT_CH, HEADS)

    out = gat_forward(params, x, adj_t, edge_weight)
    jax.block_until_ready(out)
    assert out.shape == (N, OUT_CH)
    assert bool(jnp.all(jnp.isfinite(out)))
    print("KERNEL_OK")
</pallas_src>

<mosaic_0001>
module attributes {stable_mosaic.version = 11 : i64} {
  func.func @gat_project_kernel(%arg0: i32, %arg1: memref<256x8xbf16, #tpu.memory_space<vmem>>, %arg2: memref<8x128xbf16, #tpu.memory_space<vmem>>, %arg3: memref<128x128xbf16, #tpu.memory_space<vmem>>, %arg4: memref<128x256xbf16, #tpu.memory_space<vmem>>, %arg5: memref<256x128xf32, #tpu.memory_space<vmem>>) attributes {dimension_semantics = [#tpu.dimension_semantics<parallel>], iteration_bounds = array<i64: 1>, scalar_prefetch = 0 : i64, scratch_operands = 0 : i64, tpu.core_type = #tpu.core_type<tc>, window_params = [{transform_indices = @transform_0, window_bounds = array<i64: 256, 8>}, {pipeline_mode = #tpu.pipeline_mode<synchronous>, transform_indices = @transform_1, window_bounds = array<i64: 8, 128>}, {pipeline_mode = #tpu.pipeline_mode<synchronous>, transform_indices = @transform_2, window_bounds = array<i64: 128, 128>}, {transform_indices = @transform_3, window_bounds = array<i64: 128, 256>}, {transform_indices = @transform_4, window_bounds = array<i64: 256, 128>}]} {
    %c0 = arith.constant 0 : index
    %c0_0 = arith.constant 0 : index
    %0 = vector.load %arg1[%c0, %c0_0] : memref<256x8xbf16, #tpu.memory_space<vmem>>, vector<256x8xbf16>
    %c0_1 = arith.constant 0 : index
    %c0_2 = arith.constant 0 : index
    %1 = vector.load %arg2[%c0_1, %c0_2] : memref<8x128xbf16, #tpu.memory_space<vmem>>, vector<8x128xbf16>
    %cst = arith.constant dense<0.000000e+00> : vector<256x128xf32>
    %2 = tpu.matmul %0, %1, %cst {dimension_numbers = #tpu.dot_dimension_numbers<[1], [0], [0], [1], [0, 0, 1, 1], [], []>} : vector<256x8xbf16>, vector<8x128xbf16>, vector<256x128xf32> -> vector<256x128xf32>
    %3 = arith.truncf %2 : vector<256x128xf32> to vector<256x128xbf16>
    %c0_3 = arith.constant 0 : index
    %c0_4 = arith.constant 0 : index
    %4 = vector.load %arg3[%c0_3, %c0_4] : memref<128x128xbf16, #tpu.memory_space<vmem>>, vector<128x128xbf16>
    %cst_5 = arith.constant dense<0.000000e+00> : vector<256x128xf32>
    %5 = tpu.matmul %3, %4, %cst_5 {dimension_numbers = #tpu.dot_dimension_numbers<[1], [0], [0], [1], [0, 0, 1, 1], [], []>} : vector<256x128xbf16>, vector<128x128xbf16>, vector<256x128xf32> -> vector<256x128xf32>
    %c0_6 = arith.constant 0 : index
    %c0_7 = arith.constant 0 : index
    %6 = vector.load %arg5[%c0_6, %c0_7] : memref<256x128xf32, #tpu.memory_space<vmem>>, vector<256x128xf32>
    tpu.vector_store %arg5[%c0_6, %c0_7], %5 {strides = array<i32>} : memref<256x128xf32, #tpu.memory_space<vmem>>, vector<256x128xf32>,
    %7 = tpu.transpose %2, [1, 0] : vector<256x128xf32> -> vector<128x256xf32>
    %8 = arith.truncf %7 : vector<128x256xf32> to vector<128x256xbf16>
    %c0_8 = arith.constant 0 : index
    %c0_9 = arith.constant 0 : index
    %9 = vector.load %arg4[%c0_8, %c0_9] : memref<128x256xbf16, #tpu.memory_space<vmem>>, vector<128x256xbf16>
    tpu.vector_store %arg4[%c0_8, %c0_9], %8 {strides = array<i32>} : memref<128x256xbf16, #tpu.memory_space<vmem>>, vector<128x256xbf16>,
    return
  }
  func.func @transform_0(%arg0: i32) -> (i32, i32) {
    %c0_i32 = arith.constant 0 : i32
    %c0_i32_0 = arith.constant 0 : i32
    return %arg0, %c0_i32 : i32, i32
  }
  func.func @transform_1(%arg0: i32) -> (i32, i32) {
    %c0_i32 = arith.constant 0 : i32
    %c0_i32_0 = arith.constant 0 : i32
    %c0_i32_1 = arith.constant 0 : i32
    return %c0_i32, %c0_i32_0 : i32, i32
  }
  func.func @transform_2(%arg0: i32) -> (i32, i32) {
    %c0_i32 = arith.constant 0 : i32
    %c0_i32_0 = arith.constant 0 : i32
    %c0_i32_1 = arith.constant 0 : i32
    return %c0_i32, %c0_i32_0 : i32, i32
  }
  func.func @transform_3(%arg0: i32) -> (i32, i32) {
    %c0_i32 = arith.constant 0 : i32
    %c0_i32_0 = arith.constant 0 : i32
    return %c0_i32, %arg0 : i32, i32
  }
  func.func @transform_4(%arg0: i32) -> (i32, i32) {
    %c0_i32 = arith.constant 0 : i32
    %c0_i32_0 = arith.constant 0 : i32
    return %arg0, %c0_i32 : i32, i32
  }
}

</mosaic_0001>

<bundles_post_ra>
// kernel: tpu_custom_call.1
= control target key start
LH: loop header
LB: loop body
LE: loop exit
PB: predicated region body
PF: predicated region fallthrough
CT: control target
= control target key end

     0   :  { %10 = vsyncpa [#allocation3], 0  ;;  %vm181_vm0 = vcmask 1043456   ;;  %vm132_vm1 = vcmask 64512   ;;  %s1417_s0 = inlined_call_operand.vmem [shape: bf16[256,8], index: 0, kind: input, shape index: {}]   ;;  %s1418_s1 = inlined_call_operand.vmem [shape: bf16[8,128], index: 1, kind: input, shape index: {}]   ;;  %s1419_s2 = inlined_call_operand.vmem [shape: bf16[128,128], index: 2, kind: input, shape index: {}]   ;;  %s1420_s3 = inlined_call_operand.hbm [shape: bf16[128,256], index: 3, kind: output, shape index: {0}]   ;;  %s1421_s4 = inlined_call_operand.hbm [shape: f32[256,128], index: 4, kind: output, shape index: {1}]  }
   0x1   :  { %v51_v0 = vld [vmem:[%s1418_s1] sm:$0xf]  ;;  %v1156_v3 = vld [vmem:[%s1417_s0 + $0x8] sm:$0xff]   ;;  %v1157_v4 = vld [vmem:[%s1417_s0 + $0x10] sm:$0xff]  }
   0x2   :  { %v1155_v1 = vld [vmem:[%s1417_s0] sm:$0xff]   ;;  %1038 = vmatprep.subr.msk.bf16.mxu0 %vm181_vm0, %v51_v0  ;;  %v183_v2 = vsel %vm181_vm0, %v51_v0, 0  ;;  %v1158_v5 = vld [vmem:[%s1417_s0 + $0x18] sm:$0xff]   ;;  %v1160_v7 = vld [vmem:[%s1417_s0 + $0x28] sm:$0xff]  }
   0x3   :  { %941 = vmatpush3.bf16.msra.mxu0 %v183_v2  ;;  %942 = vmatprep.mubr.msk.bf16.mxu0 %vm132_vm1, %v1155_v1  ;;  %v1159_v6 = vld [vmem:[%s1417_s0 + $0x20] sm:$0xff]   ;;  %v1161_v8 = vld [vmem:[%s1417_s0 + $0x30] sm:$0xff]   ;;  %v1172_v10 = vld [vmem:[%s1419_s2 + $0x8] sm:$0xff]  }
   0x4   :  { %v1171_v9 = vld [vmem:[%s1419_s2] sm:$0xff]   ;;  %v1173_v11 = vld [vmem:[%s1419_s2 + $0x10] sm:$0xff]  }
   0x5   :  { %974 = vmatprep.subr.bf16.mxu0 %v1171_v9  ;;  %1022 = vmatprep.subr.bf16.mxu1 %v1171_v9 }
   0x6   :  { %943 = vmatmul.mubr.msk.bf16.vlgmr.msra.gmra.mrb[0].mxu0 %vm132_vm1, %v1156_v3  ;;  %1030 = vmatpush3.bf16.msra.mxu1 %v1171_v9 }
   0x7   :  { %946 = vmatprep.mubr.msk.bf16.mxu0 %vm132_vm1, %v1157_v4  ;;  %975 = vmatpush3.bf16.msra.mxu0 %v1171_v9 }
   0x8   :  { %976 = vmatprep.subr.bf16.mxu0 %v1172_v10  ;;  %1023 = vmatprep.subr.bf16.mxu1 %v1172_v10 }
   0xa   :  { %1031 = vmatpush3.bf16.msra.mxu1 %v1172_v10 }
   0xb   :  { %977 = vmatpush3.bf16.msra.mxu0 %v1172_v10 }
   0xe   :  { %947 = vmatmul.mubr.msk.bf16.gmra.mrb[4].mxu0 %vm132_vm1, %v1158_v5 }
   0xf   :  { %950 = vmatprep.mubr.msk.bf16.mxu0 %vm132_vm1, %v1159_v6 }
  0x16   :  { %951 = vmatmul.mubr.msk.bf16.gmra.mrb[8].mxu0 %vm132_vm1, %v1160_v7 }
  0x17   :  { %954 = vmatprep.mubr.msk.bf16.mxu0 %vm132_vm1, %v1161_v8 }
  0x18   :  { %11 = vsyncpa [#allocation5], 0  ;;  %v1162_v12 = vld [vmem:[%s1417_s0 + $0x38] sm:$0xff]   ;;  %978 = vmatprep.subr.bf16.mxu0 %v1173_v11  ;;  %1024 = vmatprep.subr.bf16.mxu1 %v1173_v11  ;;  %v1163_v14 = vld [vmem:[%s1417_s0 + $0x40] sm:$0xff]  }
  0x19   :  { %v1174_v13 = vld [vmem:[%s1419_s2 + $0x18] sm:$0xff]   ;;  %979 = vmatpush3.bf16.msra.mxu0 %v1173_v11  ;;  %1032 = vmatpush3.bf16.msra.mxu1 %v1173_v11  ;;  %v1175_v15 = vld [vmem:[%s1419_s2 + $0x20] sm:$0xff]   ;;  %v1164_v16 = vld [vmem:[%s1417_s0 + $0x48] sm:$0xff]  }
  0x1a   :  { %980 = vmatprep.subr.bf16.mxu0 %v1174_v13  ;;  %1025 = vmatprep.subr.bf16.mxu1 %v1174_v13  ;;  %v1176_v17 = vld [vmem:[%s1419_s2 + $0x28] sm:$0xff]   ;;  %v1165_v18 = vld [vmem:[%s1417_s0 + $0x50] sm:$0xff]   ;;  %v1166_v20 = vld [vmem:[%s1417_s0 + $0x58] sm:$0xff]  }
  0x1b   :  { %v1177_v19 = vld [vmem:[%s1419_s2 + $0x30] sm:$0xff]   ;;  %v1167_v21 = vld [vmem:[%s1417_s0 + $0x60] sm:$0xff]   ;;  %v1168_v22 = vld [vmem:[%s1417_s0 + $0x68] sm:$0xff]  }
  0x1c   :  { %v1169_v23 = vld [vmem:[%s1417_s0 + $0x70] sm:$0xff]   ;;  %v1170_v24 = vld [vmem:[%s1417_s0 + $0x78] sm:$0xff]   ;;  %s1227_s0 = smov [#allocation2]  }
  0x1d   :  { %981 = vmatpush3.bf16.msra.mxu0 %v1174_v13  ;;  %1033 = vmatpush3.bf16.msra.mxu1 %v1174_v13  ;;  %v1178_v25 = vld [vmem:[%s1419_s2 + $0x38] sm:$0xff]   ;;  %s800_s2 = sshll.u32 %s1227_s0, 4  ;;  %s801_s2 = int_to_ptr.vmem [resolvable:$true] %s800_s2 }
  0x1e   :  { %955 = vmatmul.mubr.msk.bf16.gmra.mrb[12].mxu0 %vm132_vm1, %v1162_v12  ;;  %982 = vmatprep.subr.bf16.mxu0 %v1175_v15  ;;  %s1179_s11 = scalar_lea.vmem %s801_s2, 2048  ;;  %p1184_p1 = scmp.lt.s32.totalorder %s801_s2, %s801_s2 }
  0x1f   :  { %958 = vmatprep.mubr.msk.bf16.mxu0 %vm132_vm1, %v1163_v14  ;;  %1026 = vmatprep.subr.bf16.mxu1 %v1175_v15  ;;  %p1180_p0 = scmp.ne.s32.totalorder %s801_s2, %s1179_s11  ;;  %p1185_p2 = scmp.lt.s32.totalorder %s1179_s11, %s1179_s11 }
  0x21   :  { %983 = vmatpush3.bf16.msra.mxu0 %v1175_v15  ;;  %1034 = vmatpush3.bf16.msra.mxu1 %v1175_v15  ;;  %p1186_p3 = por %p1185_p2, %p1184_p1 }
  0x22   :  { %984 = vmatprep.subr.bf16.mxu0 %v1176_v17  ;;  %1027 = vmatprep.subr.bf16.mxu1 %v1176_v17 }
  0x23   :  { %p1187_p4 = pnand %p1186_p3, %p1180_p0 }
  0x25   :  { %985 = vmatpush3.bf16.msra.mxu0 %v1176_v17  ;;  %1035 = vmatpush3.bf16.msra.mxu1 %v1176_v17 }
  0x26   :  { %959 = vmatmul.mubr.msk.bf16.gmra.mrb[16].mxu0 %vm132_vm1, %v1164_v16  ;;  %986 = vmatprep.subr.bf16.mxu0 %v1177_v19 }
  0x27   :  { %962 = vmatprep.mubr.msk.bf16.mxu0 %vm132_vm1, %v1165_v18  ;;  %1028 = vmatprep.subr.bf16.mxu1 %v1177_v19 }
  0x29   :  { %987 = vmatpush3.bf16.msra.mxu0 %v1177_v19  ;;  %1036 = vmatpush3.bf16.msra.mxu1 %v1177_v19 }
  0x2a   :  { %988 = vmatprep.subr.bf16.mxu0 %v1178_v25  ;;  %1029 = vmatprep.subr.bf16.mxu1 %v1178_v25 }
  0x2d   :  { %989 = vmatpush3.bf16.msra.mxu0 %v1178_v25  ;;  %1037 = vmatpush3.bf16.msra.mxu1 %v1178_v25 }
  0x2e   :  { %963 = vmatmul.mubr.msk.bf16.gmra.mrb[20].mxu0 %vm132_vm1, %v1166_v20 }
  0x2f   :  { %966 = vmatprep.mubr.msk.bf16.mxu0 %vm132_vm1, %v1167_v21 }
  0x36   :  { %967 = vmatmul.mubr.msk.bf16.gmra.mrb[24].mxu0 %vm132_vm1, %v1168_v22 }
  0x37   :  { %970 = vmatprep.mubr.msk.bf16.mxu0 %vm132_vm1, %v1169_v23 }
  0x3e   :  { %971 = vmatmul.mubr.msk.bf16.gmra.mrb[28].mxu0 %vm132_vm1, %v1170_v24 }
  0xd9   :  { %v944_v26 = vpop.f32.mrb[0].mxu0 }
  0xda   :  { %v219_v27 = vpop.f32.mrb[1].mxu0 }
  0xdb   :  { %v945_v28 = vpop.f32.mrb[2].mxu0 }
  0xdc   :  { %v347_v29 = vpack.c.bf16 %v945_v28, %v944_v26  ;;  %v222_v30 = vpop.f32.mrb[3].mxu0 }
  0xdd   :  { %v346_v31 = vpack.c.bf16 %v222_v30, %v219_v27 }
  0xdf   :  { %990 = vmatprep.mubr.bf16.mxu0 %v346_v31 }
  0xe0   :  { %991 = vmatmul.mubr.bf16.vlgmr.msra.gmra.mrb[32].mxu0 %v347_v29 }
  0xe1   :  { %v1347_v32 = vpop.f32.mrb[4].mxu0 }
  0xe2   :  { %v235_v33 = vpop.f32.mrb[5].mxu0 }
  0xe3   :  { %v1349_v34 = vpop.f32.mrb[6].mxu0 }
  0xe4   :  { %v349_v35 = vpack.c.bf16 %v1349_v34, %v1347_v32  ;;  %v238_v36 = vpop.f32.mrb[7].mxu0 }
  0xe5   :  { %v348_v37 = vpack.c.bf16 %v238_v36, %v235_v33 }
  0xe7   :  { %994 = vmatprep.mubr.bf16.mxu1 %v348_v37 }
  0xe8   :  { %995 = vmatmul.mubr.bf16.vlgmr.msra.gmra.mrb[0].mxu1 %v349_v35 }
  0xe9   :  { %v1353_v38 = vpop.f32.mrb[8].mxu0 }
  0xea   :  { %v1355_v39 = vpop.f32.mrb[9].mxu0 }
  0xeb   :  { %v1357_v40 = vpop.f32.mrb[10].mxu0 }
  0xec   :  { %v351_v41 = vpack.c.bf16 %v1357_v40, %v1353_v38  ;;  %v1361_v42 = vpop.f32.mrb[11].mxu0 }
  0xed   :  { %v350_v43 = vpack.c.bf16 %v1361_v42, %v1355_v39 }
  0xef   :  { %998 = vmatprep.mubr.bf16.mxu1 %v350_v43 }
  0xf0   :  { %999 = vmatmul.mubr.bf16.gmra.mrb[4].mxu1 %v351_v41 }
  0xf1   :  { %v1365_v44 = vpop.f32.mrb[12].mxu0 }
  0xf2   :  { %v1367_v45 = vpop.f32.mrb[13].mxu0 }
  0xf3   :  { %v1369_v46 = vpop.f32.mrb[14].mxu0 }
  0xf4   :  { %v353_v47 = vpack.c.bf16 %v1369_v46, %v1365_v44  ;;  %v1373_v48 = vpop.f32.mrb[15].mxu0 }
  0xf5   :  { %v352_v49 = vpack.c.bf16 %v1373_v48, %v1367_v45 }
  0xf7   :  { %1002 = vmatprep.mubr.bf16.mxu1 %v352_v49 }
  0xf8   :  { %1003 = vmatmul.mubr.bf16.gmra.mrb[8].mxu1 %v353_v47 }
  0xf9   :  { %v960_v50 = vpop.f32.mrb[16].mxu0 }
  0xfa   :  { %v283_v51 = vpop.f32.mrb[17].mxu0  ;;  %v1047_v52 = vpack.i.bf16 %v960_v50, %v944_v26 }
  0xfb   :  { %v961_v53 = vpop.f32.mrb[18].mxu0  ;;  %v1043_v54 = vpack.i.bf16 %v283_v51, %v219_v27 }
  0xfc   :  { %v355_v55 = vpack.c.bf16 %v961_v53, %v960_v50  ;;  %v286_v56 = vpop.f32.mrb[19].mxu0  ;;  %v1049_v57 = vpack.i.bf16 %v961_v53, %v945_v28 }
  0xfd   :  { %v354_v58 = vpack.c.bf16 %v286_v56, %v283_v51  ;;  %1044 = vxpose.xlu0.b32.start [1/16] %v1043_v54, 128  ;;  %v1045_v59 = vpack.i.bf16 %v286_v56, %v222_v30 }
  0xff   :  { %1006 = vmatprep.mubr.bf16.mxu1 %v354_v58 }
 0x100   :  { %1007 = vmatmul.mubr.bf16.gmra.mrb[12].mxu1 %v355_v55 }
 0x101   :  { %1046 = vxpose.xlu0.b32.cont [2/16] %v1045_v59, 128  ;;  %v964_v60 = vpop.f32.mrb[20].mxu0 }
 0x102   :  { %v299_v61 = vpop.f32.mrb[21].mxu0  ;;  %v1055_v62 = vpack.i.bf16 %v964_v60, %v1347_v32 }
 0x103   :  { %v965_v63 = vpop.f32.mrb[22].mxu0  ;;  %v1051_v0 = vpack.i.bf16 %v299_v61, %v235_v33 }
 0x104   :  { %v357_v1 = vpack.c.bf16 %v965_v63, %v964_v60  ;;  %v302_v2 = vpop.f32.mrb[23].mxu0  ;;  %v1057_v3 = vpack.i.bf16 %v965_v63, %v1349_v34 }
 0x105   :  { %v356_v4 = vpack.c.bf16 %v302_v2, %v299_v61  ;;  %1048 = vxpose.xlu0.b32.cont [3/16] %v1047_v52, 128  ;;  %v1053_v5 = vpack.i.bf16 %v302_v2, %v238_v36 }
 0x107   :  { %1010 = vmatprep.mubr.bf16.mxu1 %v356_v4 }
 0x108   :  { %1011 = vmatmul.mubr.bf16.gmra.mrb[16].mxu1 %v357_v1 }
 0x109   :  { %1050 = vxpose.xlu0.b32.cont [4/16] %v1049_v57, 128  ;;  %v968_v6 = vpop.f32.mrb[24].mxu0 }
 0x10a   :  { %v315_v7 = vpop.f32.mrb[25].mxu0  ;;  %v1063_v8 = vpack.i.bf16 %v968_v6, %v1353_v38 }
 0x10b   :  { %v969_v9 = vpop.f32.mrb[26].mxu0  ;;  %v1059_v10 = vpack.i.bf16 %v315_v7, %v1355_v39 }
 0x10c   :  { %v359_v11 = vpack.c.bf16 %v969_v9, %v968_v6  ;;  %v318_v12 = vpop.f32.mrb[27].mxu0  ;;  %v1065_v13 = vpack.i.bf16 %v969_v9, %v1357_v40 }
 0x10d   :  { %v358_v14 = vpack.c.bf16 %v318_v12, %v315_v7  ;;  %1052 = vxpose.xlu0.b32.cont [5/16] %v1051_v0, 128  ;;  %v1061_v15 = vpack.i.bf16 %v318_v12, %v1361_v42 }
 0x10f   :  { %1014 = vmatprep.mubr.bf16.mxu1 %v358_v14 }
 0x110   :  { %1015 = vmatmul.mubr.bf16.gmra.mrb[20].mxu1 %v359_v11 }
 0x111   :  { %1054 = vxpose.xlu0.b32.cont [6/16] %v1053_v5, 128  ;;  %v972_v16 = vpop.f32.mrb[28].mxu0 }
 0x112   :  { %v331_v17 = vpop.f32.mrb[29].mxu0  ;;  %v1071_v18 = vpack.i.bf16 %v972_v16, %v1365_v44 }
 0x113   :  { %v973_v19 = vpop.f32.mrb[30].mxu0  ;;  %v1067_v20 = vpack.i.bf16 %v331_v17, %v1367_v45 }
 0x114   :  { %v361_v21 = vpack.c.bf16 %v973_v19, %v972_v16  ;;  %v334_v22 = vpop.f32.mrb[31].mxu0  ;;  %v1073_v23 = vpack.i.bf16 %v973_v19, %v1369_v46 }
 0x115   :  { %v360_v24 = vpack.c.bf16 %v334_v22, %v331_v17  ;;  %1056 = vxpose.xlu0.b32.cont [7/16] %v1055_v62, 128  ;;  %v1069_v25 = vpack.i.bf16 %v334_v22, %v1373_v48 }
 0x117   :  { %1018 = vmatprep.mubr.bf16.mxu1 %v360_v24 }
 0x118   :  { %1019 = vmatmul.mubr.bf16.gmra.mrb[24].mxu1 %v361_v21 }
 0x119   :  { %1058 = vxpose.xlu0.b32.cont [8/16] %v1057_v3, 128 }
 0x11d   :  { %1060 = vxpose.xlu0.b32.cont [9/16] %v1059_v10, 128 }
 0x121   :  { %1062 = vxpose.xlu0.b32.cont [10/16] %v1061_v15, 128 }
 0x125   :  { %1064 = vxpose.xlu0.b32.cont [11/16] %v1063_v8, 128 }
 0x129   :  { %1066 = vxpose.xlu0.b32.cont [12/16] %v1065_v13, 128 }
 0x12d   :  { %1068 = vxpose.xlu0.b32.cont [13/16] %v1067_v20, 128 }
 0x131   :  { %1070 = vxpose.xlu0.b32.cont [14/16] %v1069_v25, 128 }
 0x135   :  { %1072 = vxpose.xlu0.b32.cont [15/16] %v1071_v18, 128 }
 0x139   :  { %1074 = vxpose.xlu0.b32.end [16/16] %v1073_v23, 128 }
 0x17d   :  { %v1075_v26 = vpop.trf.xlu0 }
 0x17e   :  { %v1079_v27 = vunpack.i.h.bf16 %v1075_v26  ;;  %v1076_v28 = vunpack.i.l.bf16 %v1075_v26 }
 0x180   :  { %v883_v29 = vpack.c.bf16 %v1079_v27, %v1076_v28 }
 0x181   :  { %v1080_v30 = vpop.trf.xlu0 }
 0x182   :  { %779 = vst [vmem:[#allocation2] sm:$0xff] %v883_v29  ;;  %v1084_v31 = vunpack.i.h.bf16 %v1080_v30  ;;  %v1081_v32 = vunpack.i.l.bf16 %v1080_v30 }
 0x184   :  { %v884_v33 = vpack.c.bf16 %v1084_v31, %v1081_v32 }
 0x185   :  { %v1085_v34 = vpop.trf.xlu0 }
 0x186   :  { %780 = vst [vmem:[#allocation2 + $0x8] sm:$0xff] %v884_v33  ;;  %v1089_v35 = vunpack.i.h.bf16 %v1085_v34  ;;  %v1086_v36 = vunpack.i.l.bf16 %v1085_v34 }
 0x188   :  { %v885_v37 = vpack.c.bf16 %v1089_v35, %v1086_v36 }
 0x189   :  { %v1090_v38 = vpop.trf.xlu0 }
 0x18a   :  { %781 = vst [vmem:[#allocation2 + $0x10] sm:$0xff] %v885_v37  ;;  %v1094_v39 = vunpack.i.h.bf16 %v1090_v38  ;;  %v1091_v40 = vunpack.i.l.bf16 %v1090_v38 }
 0x18c   :  { %v886_v41 = vpack.c.bf16 %v1094_v39, %v1091_v40 }
 0x18d   :  { %v1095_v42 = vpop.trf.xlu0 }
 0x18e   :  { %782 = vst [vmem:[#allocation2 + $0x18] sm:$0xff] %v886_v41  ;;  %v1099_v43 = vunpack.i.h.bf16 %v1095_v42  ;;  %v1096_v44 = vunpack.i.l.bf16 %v1095_v42 }
 0x190   :  { %v887_v45 = vpack.c.bf16 %v1099_v43, %v1096_v44 }
 0x191   :  { %v1100_v46 = vpop.trf.xlu0 }
 0x192   :  { %783 = vst [vmem:[#allocation2 + $0x20] sm:$0xff] %v887_v45  ;;  %v1104_v47 = vunpack.i.h.bf16 %v1100_v46  ;;  %v1101_v48 = vunpack.i.l.bf16 %v1100_v46 }
 0x194   :  { %v888_v49 = vpack.c.bf16 %v1104_v47, %v1101_v48 }
 0x195   :  { %v1105_v50 = vpop.trf.xlu0 }
 0x196   :  { %784 = vst [vmem:[#allocation2 + $0x28] sm:$0xff] %v888_v49  ;;  %v1109_v51 = vunpack.i.h.bf16 %v1105_v50  ;;  %v1106_v52 = vunpack.i.l.bf16 %v1105_v50 }
 0x198   :  { %v889_v53 = vpack.c.bf16 %v1109_v51, %v1106_v52 }
 0x199   :  { %v1110_v54 = vpop.trf.xlu0 }
 0x19a   :  { %785 = vst [vmem:[#allocation2 + $0x30] sm:$0xff] %v889_v53  ;;  %v1114_v55 = vunpack.i.h.bf16 %v1110_v54  ;;  %v1111_v56 = vunpack.i.l.bf16 %v1110_v54 }
 0x19c   :  { %v890_v57 = vpack.c.bf16 %v1114_v55, %v1111_v56 }
 0x19d   :  { %v1115_v58 = vpop.trf.xlu0 }
 0x19e   :  { %786 = vst [vmem:[#allocation2 + $0x38] sm:$0xff] %v890_v57  ;;  %v1119_v59 = vunpack.i.h.bf16 %v1115_v58  ;;  %v1116_v60 = vunpack.i.l.bf16 %v1115_v58 }
 0x1a0   :  { %v891_v61 = vpack.c.bf16 %v1119_v59, %v1116_v60 }
 0x1a1   :  { %v1120_v62 = vpop.trf.xlu0 }
 0x1a2   :  { %787 = vst [vmem:[#allocation2 + $0x40] sm:$0xff] %v891_v61  ;;  %v1124_v63 = vunpack.i.h.bf16 %v1120_v62  ;;  %v1121_v0 = vunpack.i.l.bf16 %v1120_v62 }
 0x1a4   :  { %v892_v1 = vpack.c.bf16 %v1124_v63, %v1121_v0 }
 0x1a5   :  { %v1125_v2 = vpop.trf.xlu0 }
 0x1a6   :  { %788 = vst [vmem:[#allocation2 + $0x48] sm:$0xff] %v892_v1  ;;  %v1129_v3 = vunpack.i.h.bf16 %v1125_v2  ;;  %v1126_v4 = vunpack.i.l.bf16 %v1125_v2 }
 0x1a8   :  { %v893_v5 = vpack.c.bf16 %v1129_v3, %v1126_v4 }
 0x1a9   :  { %v1130_v6 = vpop.trf.xlu0 }
 0x1aa   :  { %789 = vst [vmem:[#allocation2 + $0x50] sm:$0xff] %v893_v5  ;;  %v1134_v7 = vunpack.i.h.bf16 %v1130_v6  ;;  %v1131_v8 = vunpack.i.l.bf16 %v1130_v6 }
 0x1ac   :  { %v894_v9 = vpack.c.bf16 %v1134_v7, %v1131_v8 }
 0x1ad   :  { %v1135_v10 = vpop.trf.xlu0 }
 0x1ae   :  { %790 = vst [vmem:[#allocation2 + $0x58] sm:$0xff] %v894_v9  ;;  %v1139_v11 = vunpack.i.h.bf16 %v1135_v10  ;;  %v1136_v12 = vunpack.i.l.bf16 %v1135_v10 }
 0x1b0   :  { %v895_v13 = vpack.c.bf16 %v1139_v11, %v1136_v12 }
 0x1b1   :  { %v1140_v14 = vpop.trf.xlu0 }
 0x1b2   :  { %791 = vst [vmem:[#allocation2 + $0x60] sm:$0xff] %v895_v13  ;;  %v1144_v15 = vunpack.i.h.bf16 %v1140_v14  ;;  %v1141_v16 = vunpack.i.l.bf16 %v1140_v14 }
 0x1b3   :  { %v992_v17 = vpop.f32.mrb[32].mxu0 }
 0x1b4   :  { %589 = vst [vmem:[#allocation4 + $0x10] sm:$0xff] %v992_v17  ;;  %v460_v18 = vpop.f32.mrb[33].mxu0  ;;  %v896_v19 = vpack.c.bf16 %v1144_v15, %v1141_v16 }
 0x1b5   :  { %587 = vst [vmem:[#allocation4] sm:$0xff] %v460_v18  ;;  %v993_v20 = vpop.f32.mrb[34].mxu0  ;;  %v1145_v21 = vpop.trf.xlu0 }
 0x1b6   :  { %590 = vst [vmem:[#allocation4 + $0x18] sm:$0xff] %v993_v20  ;;  %v463_v22 = vpop.f32.mrb[35].mxu0  ;;  %792 = vst [vmem:[#allocation2 + $0x68] sm:$0xff] %v896_v19  ;;  %v1149_v23 = vunpack.i.h.bf16 %v1145_v21  ;;  %v1146_v24 = vunpack.i.l.bf16 %v1145_v21 }
 0x1b7   :  { %588 = vst [vmem:[#allocation4 + $0x8] sm:$0xff] %v463_v22 }
 0x1b8   :  { %v897_v25 = vpack.c.bf16 %v1149_v23, %v1146_v24 }
 0x1b9   :  { %v1150_v26 = vpop.trf.xlu0 }
 0x1ba   :  { %793 = vst [vmem:[#allocation2 + $0x70] sm:$0xff] %v897_v25  ;;  %v1154_v27 = vunpack.i.h.bf16 %v1150_v26  ;;  %v1151_v28 = vunpack.i.l.bf16 %v1150_v26 }
 0x1bb   :  { %v996_v29 = vpop.f32.mrb[0].mxu1 }
 0x1bc   :  { %593 = vst [vmem:[#allocation4 + $0x30] sm:$0xff] %v996_v29  ;;  %v476_v30 = vpop.f32.mrb[1].mxu1  ;;  %v898_v31 = vpack.c.bf16 %v1154_v27, %v1151_v28 }
 0x1bd   :  { %591 = vst [vmem:[#allocation4 + $0x20] sm:$0xff] %v476_v30  ;;  %v997_v32 = vpop.f32.mrb[2].mxu1 }
 0x1be   :  { %594 = vst [vmem:[#allocation4 + $0x38] sm:$0xff] %v997_v32  ;;  %v479_v33 = vpop.f32.mrb[3].mxu1  ;;  %794 = vst [vmem:[#allocation2 + $0x78] sm:$0xff] %v898_v31 }
 0x1bf   :  { %592 = vst [vmem:[#allocation4 + $0x28] sm:$0xff] %v479_v33 }
 0x1c0   :  { %1190 = shalt.err (!%p1187_p4)
}
 0x1c1   :  { %s1191_s14 = scalar_lea.hbm %s1420_s3, 2048 }
 0x1c2   :  { %p1192_p5 = scmp.ne.s32.totalorder %s1420_s3, %s1191_s14  ;;  %p1195_p6 = scmp.lt.u32.totalorder %s1191_s14, %s1420_s3 }
 0x1c4   :  { %p1197_p7 = pnand %p1195_p6, %p1192_p5 }
 0x1c6   :  { %1200 = shalt.err (!%p1197_p7)
}
 0x1c7   :  { %s1228_s19 = smov 128   ;;  %s1229_s20 = smov 8   ;;  %v1000_v34 = vpop.f32.mrb[4].mxu1 }
 0x1c8   :  { %806 = dma.vmem_to_hbm [thread:$0]  %s801_s2, 2048, %s1420_s3, [#allocation3], %s1228_s19, %s1228_s19, %s1229_s20   ;;  %597 = vst [vmem:[#allocation4 + $0x50] sm:$0xff] %v1000_v34  ;;  %v492_v35 = vpop.f32.mrb[5].mxu1 }
 0x1c9   :  { %595 = vst [vmem:[#allocation4 + $0x40] sm:$0xff] %v492_v35  ;;  %v1001_v36 = vpop.f32.mrb[6].mxu1  ;;  %s1230_s3 = smov [#allocation4]  }
 0x1ca   :  { %598 = vst [vmem:[#allocation4 + $0x58] sm:$0xff] %v1001_v36  ;;  %v495_v37 = vpop.f32.mrb[7].mxu1  ;;  %s812_s1 = sshll.u32 %s1230_s3, 4  ;;  %s813_s1 = int_to_ptr.vmem [resolvable:$true] %s812_s1 }
 0x1cb   :  { %596 = vst [vmem:[#allocation4 + $0x48] sm:$0xff] %v495_v37  ;;  %v1004_v38 = vpop.f32.mrb[8].mxu1  ;;  %s1201_s23 = scalar_lea.vmem %s813_s1, 4096  ;;  %p1206_p9 = scmp.lt.s32.totalorder %s813_s1, %s813_s1 }
 0x1cc   :  { %601 = vst [vmem:[#allocation4 + $0x70] sm:$0xff] %v1004_v38  ;;  %v508_v39 = vpop.f32.mrb[9].mxu1  ;;  %p1202_p8 = scmp.ne.s32.totalorder %s813_s1, %s1201_s23  ;;  %p1207_p10 = scmp.lt.s32.totalorder %s1201_s23, %s1201_s23 }
 0x1cd   :  { %599 = vst [vmem:[#allocation4 + $0x60] sm:$0xff] %v508_v39  ;;  %v1005_v40 = vpop.f32.mrb[10].mxu1 }
 0x1ce   :  { %602 = vst [vmem:[#allocation4 + $0x78] sm:$0xff] %v1005_v40  ;;  %v511_v41 = vpop.f32.mrb[11].mxu1  ;;  %p1208_p11 = por %p1207_p10, %p1206_p9 }
 0x1cf   :  { %600 = vst [vmem:[#allocation4 + $0x68] sm:$0xff] %v511_v41 }
 0x1d0   :  { %p1209_p12 = pnand %p1208_p11, %p1202_p8 }
 0x1d3   :  { %v1008_v42 = vpop.f32.mrb[12].mxu1 }
 0x1d4   :  { %605 = vst [vmem:[#allocation4 + $0x90] sm:$0xff] %v1008_v42  ;;  %v524_v43 = vpop.f32.mrb[13].mxu1 }
 0x1d5   :  { %603 = vst [vmem:[#allocation4 + $0x80] sm:$0xff] %v524_v43  ;;  %v1009_v44 = vpop.f32.mrb[14].mxu1 }
 0x1d6   :  { %606 = vst [vmem:[#allocation4 + $0x98] sm:$0xff] %v1009_v44  ;;  %v527_v45 = vpop.f32.mrb[15].mxu1 }
 0x1d7   :  { %604 = vst [vmem:[#allocation4 + $0x88] sm:$0xff] %v527_v45 }
 0x1db   :  { %v1012_v46 = vpop.f32.mrb[16].mxu1 }
 0x1dc   :  { %609 = vst [vmem:[#allocation4 + $0xb0] sm:$0xff] %v1012_v46  ;;  %v540_v47 = vpop.f32.mrb[17].mxu1 }
 0x1dd   :  { %607 = vst [vmem:[#allocation4 + $0xa0] sm:$0xff] %v540_v47  ;;  %v1013_v48 = vpop.f32.mrb[18].mxu1 }
 0x1de   :  { %610 = vst [vmem:[#allocation4 + $0xb8] sm:$0xff] %v1013_v48  ;;  %v543_v49 = vpop.f32.mrb[19].mxu1 }
 0x1df   :  { %608 = vst [vmem:[#allocation4 + $0xa8] sm:$0xff] %v543_v49 }
 0x1e3   :  { %v1016_v50 = vpop.f32.mrb[20].mxu1 }
 0x1e4   :  { %613 = vst [vmem:[#allocation4 + $0xd0] sm:$0xff] %v1016_v50  ;;  %v556_v51 = vpop.f32.mrb[21].mxu1 }
 0x1e5   :  { %611 = vst [vmem:[#allocation4 + $0xc0] sm:$0xff] %v556_v51  ;;  %v1017_v52 = vpop.f32.mrb[22].mxu1 }
 0x1e6   :  { %614 = vst [vmem:[#allocation4 + $0xd8] sm:$0xff] %v1017_v52  ;;  %v559_v53 = vpop.f32.mrb[23].mxu1 }
 0x1e7   :  { %612 = vst [vmem:[#allocation4 + $0xc8] sm:$0xff] %v559_v53 }
 0x1eb   :  { %v1020_v54 = vpop.f32.mrb[24].mxu1 }
 0x1ec   :  { %617 = vst [vmem:[#allocation4 + $0xf0] sm:$0xff] %v1020_v54  ;;  %v572_v55 = vpop.f32.mrb[25].mxu1 }
 0x1ed   :  { %615 = vst [vmem:[#allocation4 + $0xe0] sm:$0xff] %v572_v55  ;;  %v1021_v56 = vpop.f32.mrb[26].mxu1 }
 0x1ee   :  { %618 = vst [vmem:[#allocation4 + $0xf8] sm:$0xff] %v1021_v56  ;;  %v575_v57 = vpop.f32.mrb[27].mxu1 }
 0x1ef   :  { %616 = vst [vmem:[#allocation4 + $0xe8] sm:$0xff] %v575_v57 }
 0x1f0   :  { %1212 = shalt.err (!%p1209_p12)
}
 0x1f1   :  { %s1213_s26 = scalar_lea.hbm %s1421_s4, 4096 }
 0x1f2   :  { %p1214_p13 = scmp.ne.s32.totalorder %s1421_s4, %s1213_s26  ;;  %p1217_p0 = scmp.lt.u32.totalorder %s1213_s26, %s1421_s4 }
 0x1f4   :  { %p1219_p1 = pnand %p1217_p0, %p1214_p13 }
 0x1f6   :  { %1222 = shalt.err (!%p1219_p1)
}
 0x1f7   :  { %818 = dma.vmem_to_hbm [thread:$0]  %s813_s1, 4096, %s1421_s4, [#allocation5], %s1228_s19, %s1228_s19, %s1229_s20  }
 0x1f8   :  { %1223 = dma.done.wait [#allocation3], 2048  }
 0x1f9   :  { %1224 = vsyncadd [#allocation3], 4294965248 }
 0x1fa   :  { %1225 = dma.done.wait [#allocation5], 4096  }
 0x1fb   :  { %1226 = vsyncadd [#allocation5], 4294963200 }
 0x1fc   :  { %825 = vsyncpa [#allocation3], 1 }
 0x1fd   :  { %826 = vsyncpa [#allocation5], 1 }

</bundles_post_ra>
